<compile_context>
chip_gen: v5e
topology: v5e:2x2
jax: 0.10.0
libtpu: 0.0.40
codegen_flags: <defaults>
</compile_context>

<pallas_src>
import jax
import jax.numpy as jnp
from jax.experimental import pallas as pl
from jax.experimental.pallas import tpu as pltpu

BN_EPS = 1e-5
BN_SCALE = (1.0 + BN_EPS) ** -0.5      # BatchNorm1d eval, running stats (0, 1)
LEAKY_SLOPE = 0.01
_VMEM_BUDGET = 40 * 1024 * 1024        # sized for v7x's 64 MiB physical VMEM


# ----------------------------- Pallas kernels -----------------------------

def _hidden_layer_kernel(a_ref, x_ref, w_ref, b_ref, o_ref):
    """Fused (A_tile @ X) @ W_folded + b_folded -> LeakyReLU (BN folded into W, b)."""
    ax = jnp.dot(a_ref[...], x_ref[...], preferred_element_type=jnp.float32)
    agg = jnp.dot(ax, w_ref[...], preferred_element_type=jnp.float32) + b_ref[...]
    y = jnp.where(agg >= 0.0, agg, LEAKY_SLOPE * agg)
    o_ref[...] = y.astype(o_ref.dtype)


def _out_layer_kernel(a_ref, x_ref, w_ref, o_ref):
    """Fused (A_tile @ X) @ W -> sigmoid."""
    ax = jnp.dot(a_ref[...], x_ref[...], preferred_element_type=jnp.float32)
    agg = jnp.dot(ax, w_ref[...], preferred_element_type=jnp.float32)
    o_ref[...] = (1.0 / (1.0 + jnp.exp(-agg))).astype(o_ref.dtype)


# ----------------------------- tiling helpers ------------------------------

def _round_up(x, m):
    return ((x + m - 1) // m) * m


def _row_tile(n_pad, fin_pad, fout_pad, budget=_VMEM_BUDGET):
    """Largest row tile TM (divisor of n_pad, >=2 grid steps when possible)
    such that double-buffered A/out tiles + resident X/W/b fit the budget."""
    resident = 2 * (n_pad * fin_pad * 2 + fin_pad * fout_pad * 4 + fout_pad * 4)
    avail = max(budget - resident, 2 * 1024 * 1024)
    row_bytes = n_pad * 2 + fout_pad * 4          # bf16 A row + f32 out row
    for tm in (512, 256, 128, 64, 32, 16, 8):
        if n_pad % tm:
            continue
        if n_pad // tm < 2 and n_pad > 8:
            continue                              # keep >=2 steps so DMA pipelines
        if 2 * tm * row_bytes <= avail:
            return tm
    return 8


def _vmem_limit(n_pad, fin_pad, fout_pad, tm):
    est = (2 * (n_pad * fin_pad * 2 + fin_pad * fout_pad * 4 + fout_pad * 4)
           + 2 * tm * (n_pad * 2 + fout_pad * 4))
    return int(min(max(est * 3 // 2, 32 * 1024 * 1024), 48 * 1024 * 1024))


# ----------------------------- layer wrappers -------------------------------

def hidden_gcn_layer(adj, x, w_fold, b_fold):
    n_pad = adj.shape[0]
    fin_pad = x.shape[1]
    fout_pad = w_fold.shape[1]
    tm = _row_tile(n_pad, fin_pad, fout_pad)
    return pl.pallas_call(
        _hidden_layer_kernel,
        out_shape=jax.ShapeDtypeStruct((n_pad, fout_pad), jnp.bfloat16),
        grid=(n_pad // tm,),
        in_specs=[
            pl.BlockSpec((tm, n_pad), lambda i: (i, 0)),
            pl.BlockSpec((n_pad, fin_pad), lambda i: (0, 0)),
            pl.BlockSpec((fin_pad, fout_pad), lambda i: (0, 0)),
            pl.BlockSpec((1, fout_pad), lambda i: (0, 0)),
        ],
        out_specs=pl.BlockSpec((tm, fout_pad), lambda i: (i, 0)),
        compiler_params=pltpu.CompilerParams(
            dimension_semantics=("parallel",),
            vmem_limit_bytes=_vmem_limit(n_pad, fin_pad, fout_pad, tm)),
    )(adj, x, w_fold, b_fold)


def out_gcn_layer(adj, x, w_t):
    n_pad = adj.shape[0]
    fin_pad = x.shape[1]
    fout_pad = w_t.shape[1]
    tm = _row_tile(n_pad, fin_pad, fout_pad)
    return pl.pallas_call(
        _out_layer_kernel,
        out_shape=jax.ShapeDtypeStruct((n_pad, fout_pad), jnp.float32),
        grid=(n_pad // tm,),
        in_specs=[
            pl.BlockSpec((tm, n_pad), lambda i: (i, 0)),
            pl.BlockSpec((n_pad, fin_pad), lambda i: (0, 0)),
            pl.BlockSpec((fin_pad, fout_pad), lambda i: (0, 0)),
        ],
        out_specs=pl.BlockSpec((tm, fout_pad), lambda i: (i, 0)),
        compiler_params=pltpu.CompilerParams(
            dimension_semantics=("parallel",),
            vmem_limit_bytes=_vmem_limit(n_pad, fin_pad, fout_pad, tm)),
    )(adj, x, w_t)


# ------------------------- plain-JAX glue (setup) --------------------------

def build_adj_gcn_norm_mean(edge_index, num_nodes, edge_weight=None):
    """Dense aggregation for GCNConv(normalize=True, aggr='mean').

    PyG gcn_norm: add self-loops (weight 1), deg = scatter_add(w, col),
    norm_e = deg[row]^-1/2 * w_e * deg[col]^-1/2; the normalized messages
    (source j=row) are then aggregated at targets (i=col) with a *mean*
    reduction because aggr='mean' overrides GCNConv's default sum.
    """
    row, col = edge_index[0], edge_index[1]
    e = row.shape[0]
    w = jnp.ones((e,), jnp.float32) if edge_weight is None else edge_weight.astype(jnp.float32)
    loop = jnp.arange(num_nodes, dtype=row.dtype)
    row = jnp.concatenate([row, loop])
    col = jnp.concatenate([col, loop])
    w = jnp.concatenate([w, jnp.ones((num_nodes,), jnp.float32)])

    deg = jnp.zeros((num_nodes,), jnp.float32).at[col].add(w)
    dinv = jnp.where(deg > 0, deg ** -0.5, 0.0)
    norm = dinv[row] * w * dinv[col]

    adj = jnp.zeros((num_nodes, num_nodes), jnp.float32).at[col, row].add(norm)
    cnt = jnp.zeros((num_nodes,), jnp.float32).at[col].add(1.0)
    adj = adj / jnp.where(cnt > 0, cnt, 1.0)[:, None]
    return adj


def build_adj_plain_mean(edge_index, num_nodes, edge_weight=None):
    """Dense aggregation for GCNConv(normalize=False, aggr='mean') — no self-loops."""
    row, col = edge_index[0], edge_index[1]
    e = row.shape[0]
    w = jnp.ones((e,), jnp.float32) if edge_weight is None else edge_weight.astype(jnp.float32)
    adj = jnp.zeros((num_nodes, num_nodes), jnp.float32).at[col, row].add(w)
    cnt = jnp.zeros((num_nodes,), jnp.float32).at[col].add(1.0)
    adj = adj / jnp.where(cnt > 0, cnt, 1.0)[:, None]
    return adj


def _pad2(a, rows, cols):
    r, c = a.shape
    return jnp.pad(a, ((0, rows - r), (0, cols - c)))


def xavier_uniform(key, fan_out, fan_in):
    bound = jnp.sqrt(6.0 / (fan_in + fan_out))
    # torch.nn.Linear weight shape: (out, in); store W^T (in, out) for X @ W^T.
    return jax.random.uniform(key, (fan_in, fan_out), jnp.float32, -bound, bound)


def init_nocdnet_params(key, gcntrans):
    """Deterministic synthetic parameters matching NOCDnet.__init__ shapes."""
    params = {"hidden": [], "out": None}
    n_layers = len(gcntrans)
    for i in range(n_layers - 2):
        key, kw, kb = jax.random.split(key, 3)
        w_t = xavier_uniform(kw, gcntrans[i + 1], gcntrans[i])
        # PyG GCNConv bias is zero-init; use small random values to keep it non-trivial.
        b = 0.01 * jax.random.normal(kb, (1, gcntrans[i + 1]), jnp.float32)
        params["hidden"].append((w_t, b))
    key, kw = jax.random.split(key)
    params["out"] = xavier_uniform(kw, gcntrans[-1], gcntrans[-2])
    return params


def nocdnet_forward(params, x, edge_index, edge_weight=None):
    n, f_in = x.shape
    n_pad = _round_up(max(n, 8), 8)

    # Dense aggregation matrices (bf16 at the kernel boundary — dominant HBM stream).
    adj_hidden = _pad2(build_adj_gcn_norm_mean(edge_index, n, edge_weight),
                       n_pad, n_pad).astype(jnp.bfloat16)
    adj_out = _pad2(build_adj_plain_mean(edge_index, n, edge_weight),
                    n_pad, n_pad).astype(jnp.bfloat16)

    fin_pad = _round_up(f_in, 128)
    xi = _pad2(x, n_pad, fin_pad).astype(jnp.bfloat16)

    for (w_t, b) in params["hidden"]:
        fo = w_t.shape[1]
        fo_pad = _round_up(fo, 128)
        # Fold the BatchNorm eval scale into W and b (exact: LeakyReLU(c*z)=c*LeakyReLU(z), c>0).
        w_fold = _pad2(w_t * BN_SCALE, fin_pad, fo_pad).astype(jnp.float32)
        b_fold = _pad2(b * BN_SCALE, 1, fo_pad).astype(jnp.float32)
        xi = hidden_gcn_layer(adj_hidden, xi, w_fold, b_fold)   # (n_pad, fo_pad) bf16
        fin_pad = fo_pad

    w_out = params["out"]
    fo = w_out.shape[1]
    fo_pad = _round_up(fo, 128)
    w_out_p = _pad2(w_out, fin_pad, fo_pad).astype(jnp.float32)
    y = out_gcn_layer(adj_out, xi, w_out_p)                     # (n_pad, fo_pad) f32
    return y[:n, :fo]


# --------------------------------- driver ----------------------------------

if __name__ == "__main__":
    key = jax.random.PRNGKey(0)

    # Small shapes: 256 nodes, gcntrans = [16, 32, 32, 8] -> two hidden GCN layers + output GCN.
    num_nodes = 256
    num_edges = 1024
    gcntrans = [16, 32, 32, 8]

    key, kx, ke, kp = jax.random.split(key, 4)
    x = jax.random.normal(kx, (num_nodes, gcntrans[0]), jnp.float32)
    edge_index = jax.random.randint(ke, (2, num_edges), 0, num_nodes, jnp.int32)

    params = init_nocdnet_params(kp, gcntrans)

    out = nocdnet_forward(params, x, edge_index)
    out = jax.block_until_ready(out)

    assert out.shape == (num_nodes, gcntrans[-1])
    assert bool(jnp.all(jnp.isfinite(out)))
    assert bool(jnp.all((out >= 0.0) & (out <= 1.0)))  # sigmoid range
    print("KERNEL_OK")
</pallas_src>

<mosaic_0001>
module attributes {stable_mosaic.version = 11 : i64} {
  func.func @_hidden_layer_kernel(%arg0: i32, %arg1: memref<128x256xbf16, #tpu.memory_space<vmem>>, %arg2: memref<256x128xbf16, #tpu.memory_space<vmem>>, %arg3: memref<128x128xf32, #tpu.memory_space<vmem>>, %arg4: memref<1x128xf32, #tpu.memory_space<vmem>>, %arg5: memref<128x128xbf16, #tpu.memory_space<vmem>>) attributes {dimension_semantics = [#tpu.dimension_semantics<parallel>], iteration_bounds = array<i64: 2>, scalar_prefetch = 0 : i64, scratch_operands = 0 : i64, tpu.core_type = #tpu.core_type<tc>, window_params = [{transform_indices = @transform_0, window_bounds = array<i64: 128, 256>}, {pipeline_mode = #tpu.pipeline_mode<synchronous>, transform_indices = @transform_1, window_bounds = array<i64: 256, 128>}, {pipeline_mode = #tpu.pipeline_mode<synchronous>, transform_indices = @transform_2, window_bounds = array<i64: 128, 128>}, {pipeline_mode = #tpu.pipeline_mode<synchronous>, transform_indices = @transform_3, window_bounds = array<i64: 1, 128>}, {transform_indices = @transform_4, window_bounds = array<i64: 128, 128>}]} {
    %c0 = arith.constant 0 : index
    %c0_0 = arith.constant 0 : index
    %0 = vector.load %arg1[%c0, %c0_0] : memref<128x256xbf16, #tpu.memory_space<vmem>>, vector<128x256xbf16>
    %c0_1 = arith.constant 0 : index
    %c0_2 = arith.constant 0 : index
    %1 = vector.load %arg2[%c0_1, %c0_2] : memref<256x128xbf16, #tpu.memory_space<vmem>>, vector<256x128xbf16>
    %cst = arith.constant dense<0.000000e+00> : vector<128x128xf32>
    %2 = tpu.matmul %0, %1, %cst {dimension_numbers = #tpu.dot_dimension_numbers<[1], [0], [0], [1], [0, 0, 1, 1], [], []>} : vector<128x256xbf16>, vector<256x128xbf16>, vector<128x128xf32> -> vector<128x128xf32>
    %c0_3 = arith.constant 0 : index
    %c0_4 = arith.constant 0 : index
    %3 = vector.load %arg3[%c0_3, %c0_4] : memref<128x128xf32, #tpu.memory_space<vmem>>, vector<128x128xf32>
    %cst_5 = arith.constant dense<0.000000e+00> : vector<128x128xf32>
    %4 = tpu.matmul %2, %3, %cst_5 {dimension_numbers = #tpu.dot_dimension_numbers<[1], [0], [0], [1], [0, 0, 1, 1], [], []>} : vector<128x128xf32>, vector<128x128xf32>, vector<128x128xf32> -> vector<128x128xf32>
    %c0_6 = arith.constant 0 : index
    %c0_7 = arith.constant 0 : index
    %5 = vector.load %arg4[%c0_6, %c0_7] : memref<1x128xf32, #tpu.memory_space<vmem>>, vector<1x128xf32>
    %6 = vector.broadcast %5 : vector<1x128xf32> to vector<128x128xf32>
    %7 = arith.addf %4, %6 : vector<128x128xf32>
    %cst_8 = arith.constant 0.000000e+00 : f32
    %8 = vector.broadcast %cst_8 : f32 to vector<128x128xf32>
    %9 = arith.cmpf oge, %7, %8 : vector<128x128xf32>
    %cst_9 = arith.constant 0.00999999977 : f32
    %10 = vector.broadcast %cst_9 : f32 to vector<128x128xf32>
    %11 = arith.mulf %10, %7 : vector<128x128xf32>
    %12 = arith.select %9, %7, %11 : vector<128x128xi1>, vector<128x128xf32>
    %13 = arith.truncf %12 : vector<128x128xf32> to vector<128x128xbf16>
    %c0_10 = arith.constant 0 : index
    %c0_11 = arith.constant 0 : index
    %14 = vector.load %arg5[%c0_10, %c0_11] : memref<128x128xbf16, #tpu.memory_space<vmem>>, vector<128x128xbf16>
    tpu.vector_store %arg5[%c0_10, %c0_11], %13 {strides = array<i32>} : memref<128x128xbf16, #tpu.memory_space<vmem>>, vector<128x128xbf16>,
    return
  }
  func.func @transform_0(%arg0: i32) -> (i32, i32) {
    %c0_i32 = arith.constant 0 : i32
    %c0_i32_0 = arith.constant 0 : i32
    return %arg0, %c0_i32 : i32, i32
  }
  func.func @transform_1(%arg0: i32) -> (i32, i32) {
    %c0_i32 = arith.constant 0 : i32
    %c0_i32_0 = arith.constant 0 : i32
    %c0_i32_1 = arith.constant 0 : i32
    return %c0_i32, %c0_i32_0 : i32, i32
  }
  func.func @transform_2(%arg0: i32) -> (i32, i32) {
    %c0_i32 = arith.constant 0 : i32
    %c0_i32_0 = arith.constant 0 : i32
    %c0_i32_1 = arith.constant 0 : i32
    return %c0_i32, %c0_i32_0 : i32, i32
  }
  func.func @transform_3(%arg0: i32) -> (i32, i32) {
    %c0_i32 = arith.constant 0 : i32
    %c0_i32_0 = arith.constant 0 : i32
    %c0_i32_1 = arith.constant 0 : i32
    return %c0_i32, %c0_i32_0 : i32, i32
  }
  func.func @transform_4(%arg0: i32) -> (i32, i32) {
    %c0_i32 = arith.constant 0 : i32
    %c0_i32_0 = arith.constant 0 : i32
    return %arg0, %c0_i32 : i32, i32
  }
}

</mosaic_0001>

<bundles_post_ra>
// kernel: tpu_custom_call.1
= control target key start
LH: loop header
LB: loop body
LE: loop exit
PB: predicated region body
PF: predicated region fallthrough
CT: control target
= control target key end

     0   :  { %9 = vsyncpa [#allocation3], 0  ;;  %s1593_s0 = inlined_call_operand.hbm [shape: bf16[256,256], index: 0, kind: input, shape index: {}]   ;;  %s1594_s1 = inlined_call_operand.hbm [shape: bf16[256,128], index: 1, kind: input, shape index: {}]   ;;  %s1595_s2 = inlined_call_operand.hbm [shape: f32[128,128], index: 2, kind: input, shape index: {}]   ;;  %s1596_s3 = inlined_call_operand.vmem [shape: f32[1,128], index: 3, kind: input, shape index: {}]   ;;  %s1597_s4 = inlined_call_operand.hbm [shape: bf16[256,128], index: 4, kind: output, shape index: {}]  }
   0x1   :  { %11 = vsyncpa [#allocation3 + $0x1], 0 }
   0x2   :  { %12 = vsyncpa [#allocation6], 0 }
   0x3   :  { %13 = vsyncpa [#allocation4], 0 }
   0x4   :  { %15 = vsyncpa [#allocation4 + $0x1], 0  ;;  %s1379_s15 = smov 0   ;;  %s1381_s16 = smov 0  }
   0x5   :  { %s1383_s17 = smov 0   ;;  %s1385_s18 = smov 0  }
   0x6 LB: > { %s1400_s19 = sadd.s32 4294967295, %s1344_s18   ;;  %s849_s20 = sadd.s32 4294967294, %s1344_s18   ;;  %s1344_s18 = sphi %s1385_s18, %s1607_s18   ;;  %s1340_s17 = sphi %s1383_s17, %s1606_s17   ;;  %s1336_s16 = sphi %s1381_s16, %s1605_s16   ;;  %s1332_s15 = sphi %s1379_s15, %s1604_s15  }
   0x7   : > { %p41_p0 = scmp.ne.s32.totalorder %s1336_s16, %s1332_s15  ;;  %p42_p1 = scmp.eq.s32.totalorder %s1400_s19, 0 }
   0x8   : > { %p128_p2 = scmp.eq.s32.totalorder %s1400_s19, 1  ;;  %p134_p3 = scmp.eq.s32.totalorder %s849_s20, 1 }
   0x9   : > { %p1409_p4 = por %p42_p1, %p41_p0  ;;  %p850_p5 = scmp.ge.s32.totalorder %s1344_s18, 1 }
   0xa   : > { %p1414_p6 = por %p134_p3, %p41_p0  ;;  %p141_p7 = scmp.lt.s32.totalorder %s1344_s18, 3 }
   0xb   : > { %s152_s25 = sshll.u32 %s1594_s1, 4  ;;  %s1346_s27 = smov [#allocation5]   ;;  %s153_s25 = int_to_ptr.hbm [resolvable:$true] %s152_s25 }
   0xc   : > { %p1422_p8 = pnand %p850_p5, %p141_p7  ;;  %s154_s28 = sshll.u32 %s1346_s27, 4  ;;  %s155_s28 = int_to_ptr.vmem [resolvable:$true] %s154_s28 }
   0xd   : > { %s166_s5 = sshll.u32 %s1595_s2, 4  ;;  %s1347_s6 = smov 64   ;;  %s167_s5 = int_to_ptr.hbm [resolvable:$true] %s166_s5 }
   0xe   : > { %p1122_p9 = pneg %p1422_p8  ;;  %s1348_s7 = smov 4  }
   0xf   : > { %s1349_s8 = smov [#allocation7]   ;;  %s1350_s10 = smov 128  }
  0x10   : > { %p1123_p10 = pnand %p1122_p9, %p42_p1  ;;  %s168_s9 = sshll.u32 %s1349_s8, 4  ;;  %s169_s9 = int_to_ptr.vmem [resolvable:$true] %s168_s9 }
  0x11   : > { %s1351_s11 = smov 8   ;;  %s1438_s12 = sadd.s32 1, %s1344_s18  }
  0x12   : > { %1125 = dma.hbm_to_vmem [thread:$0]  (!%p1123_p10), %s153_s25, 2048, %s155_s28, [#allocation6], %s1347_s6, %s1347_s6, %s1348_s7  }
  0x13   : > { %1128 = dma.hbm_to_vmem [thread:$0]  (!%p1123_p10), %s167_s5, 2048, %s169_s9, [#allocation6], %s1350_s10, %s1350_s10, %s1351_s11  }
  0x14   : > { %s25_s13 = ssub.s32 %s1344_s18, %s1438_s12  ;;  %s28_s14 = sadd.s32 1, %s1340_s17 }
  0x15   : > { %p26_p12 = scmp.eq.s32.totalorder %s25_s13, 0  ;;  %p35_p13 = scmp.ne.s32.totalorder %s1340_s17, %s1336_s16 }
  0x16   : > { %p36_p0 = scmp.eq.s32.totalorder %s1344_s18, 0  ;;  %p1139_p7 = scmp.lt.s32.totalorder %s1344_s18, 2 }
  0x17   : > { %s1447_s20 = scalar_select %p26_p12, %s1340_s17, %s28_s14  }
  0x18   : > { %p37_p3 = por %p36_p0, %p35_p13  ;;  %p1451_p5 = por %p128_p2, %p35_p13 }
  0x19   : > { %s185_s24 = sand.u32 1, %s1340_s17   ;;  %s997_s27 = sshll.u32 %s1344_s18, 7 }
  0x1a   : > { %s854_s25 = sshll.u32 %s185_s24, 7  ;;  %s195_s30 = scalar_lea.hbm %s1593_s0, %s997_s27 }
  0x1b   : > { %s189_s5 = scalar_lea.vmem [#allocation2], %s854_s25  ;;  %s196_s7 = sshll.u32 %s195_s30, 4  ;;  %s197_s7 = int_to_ptr.hbm [resolvable:$true] %s196_s7 }
  0x1c   : > { %s198_s6 = sshll.u32 %s189_s5, 4  ;;  %p1461_p9 = pnand %p1139_p7, %p37_p3  ;;  %s199_s6 = int_to_ptr.vmem [resolvable:$true] %s198_s6 }
  0x1d   : > { %s186_s9 = scalar_lea.sflag [#allocation3], %s185_s24  ;;  %s1244_s13 = sshra.s32 %s197_s7, 4  ;;  %s1245_s13 = int_to_ptr.hbm [resolvable:$true] %s1244_s13 }
  0x1e   : > { %s1246_s14 = scalar_lea.hbm %s1245_s13, 128  ;;  %p1248_p10 = pneg %p1461_p9 }
  0x1f   : > { %p1247_p2 = scmp.ne.s32.totalorder %s1245_s13, %s1246_s14  ;;  %s1251_s28 = scalar_lea.hbm %s1593_s0, 256 }
  0x20   : > { %p1252_p0 = scmp.lt.s32.totalorder %s1245_s13, %s1593_s0  ;;  %p1253_p3 = scmp.lt.s32.totalorder %s1251_s28, %s1246_s14 }
  0x21   : > { %p1249_p12 = pnand %p1248_p10, %p1247_p2 }
  0x22   : > { %p1254_p7 = por %p1253_p3, %p1252_p0 }
  0x23   : > { %p1250_p13 = pneg %p1249_p12 }
  0x25   : > { %p1255_p11 = pnand %p1254_p7, %p1250_p13 }
  0x27   : > { %1258 = shalt.err (!%p1255_p11)
}
  0x28   : > { %1132 = dma.hbm_to_vmem [thread:$0]  (!%p1461_p9), %s197_s7, 2048, %s199_s6, %s186_s9, %s1350_s10, %s1350_s10, %s1351_s11  }
  0x29   : > { %210 = sbr.rel (%p1422_p8) target bundleno = 441 (0x1b9), region = 36  ;;  %s1481_s24 = sand.u32 (!%p1422_p8), 1, %s1336_s16  }
  0x2a   : > { %s859_s5 = sshll.u32 (!%p1422_p8), %s1481_s24, 7  ;;  %s213_s13 = scalar_lea.sflag (!%p1422_p8), [#allocation3], %s1481_s24 }
  0x2b   : > { %s1485_s14 = scalar_lea.vmem (!%p1422_p8), [#allocation2], %s859_s5 }
  0x2e   : > { %1319 = dma.done.wait (%p1409_p4), %s213_s13, 2048  }
  0x2f   : > { %1321 = vsyncadd (%p1409_p4), %s213_s13, 4294965248 }
  0x30   : > { %1323 = dma.done.wait (%p42_p1), [#allocation6], 4096  }
  0x31   : > { %1325 = vsyncadd (%p42_p1), [#allocation6], 4294963200  ;;  %v1021_v0 = vld [vmem:[#allocation5 + $0x38] sm:$0xff]  ;;  %v1020_v2 = vld [vmem:[#allocation5 + $0x30] sm:$0xff]  ;;  %s862_s10 = sshll.u32 %s1481_s24, 6  ;;  %s1030_s6 = sshll.u32 %s1400_s19, 6 }
  0x32   : > { %v1029_v1 = vld [vmem:[#allocation5 + $0x78] sm:$0xff]  ;;  %478 = vmatpush.bf16.msra.mxu0 %v1021_v0  ;;  %1078 = vmatpush.bf16.msra.mxu3 %v1021_v0  ;;  %v1028_v3 = vld [vmem:[#allocation5 + $0x70] sm:$0xff]  ;;  %v1019_v4 = vld [vmem:[#allocation5 + $0x28] sm:$0xff]  ;;  %s1535_s11 = scalar_lea.vmem [#allocation8], %s862_s10  ;;  %s753_s9 = scalar_lea.hbm %s1597_s4, %s1030_s6 }
  0x33   : > { %527 = vmatpush.bf16.msra.mxu1 %v1029_v1  ;;  %v1027_v5 = vld [vmem:[#allocation5 + $0x68] sm:$0xff]  ;;  %v1018_v6 = vld [vmem:[#allocation5 + $0x20] sm:$0xff]  ;;  %v1017_v8 = vld [vmem:[#allocation5 + $0x18] sm:$0xff]  ;;  %s754_s27 = sshll.u32 %s1535_s11, 4  ;;  %s756_s25 = sshll.u32 %s753_s9, 4  ;;  %s755_s27 = int_to_ptr.vmem [resolvable:$true] %s754_s27  ;;  %s757_s25 = int_to_ptr.hbm [resolvable:$true] %s756_s25 }
  0x34   : > { %v1026_v7 = vld [vmem:[#allocation5 + $0x60] sm:$0xff]  ;;  %v1025_v9 = vld [vmem:[#allocation5 + $0x58] sm:$0xff]  ;;  %v1016_v10 = vld [vmem:[#allocation5 + $0x10] sm:$0xff]  ;;  %s742_s19 = scalar_lea.sflag [#allocation4], %s1481_s24  ;;  %s1288_s28 = sshra.s32 %s757_s25, 4  ;;  %s1289_s28 = int_to_ptr.hbm [resolvable:$true] %s1288_s28 }
  0x35   : > { %v1024_v11 = vld [vmem:[#allocation5 + $0x50] sm:$0xff]  ;;  %v1015_v12 = vld [vmem:[#allocation5 + $0x8] sm:$0xff]  ;;  %v1014_v14 = vld [vmem:[#allocation5] sm:$0xff]  ;;  %s1290_s29 = scalar_lea.hbm %s1289_s28, 64  ;;  %s1294_s13 = scalar_lea.hbm %s1597_s4, 128 }
  0x36   : > { %479 = vmatpush.bf16.msra.mxu0 %v1020_v2  ;;  %1079 = vmatpush.bf16.msra.mxu3 %v1020_v2  ;;  %v1023_v13 = vld [vmem:[#allocation5 + $0x48] sm:$0xff]  ;;  %v865_v15 = vld [vmem:[%s1485_s14] sm:$0xf]  ;;  %v998_v20 = vld [vmem:[%s1485_s14 + $0x4] sm:$0xf]  ;;  %p1291_p1 = scmp.ne.s32.totalorder %s1289_s28, %s1290_s29  ;;  %p1295_p11 = scmp.lt.s32.totalorder %s1289_s28, %s1597_s4 }
  0x37   : > { %528 = vmatpush.bf16.msra.mxu1 %v1028_v3  ;;  %v999_v16 = vld [vmem:[%s1485_s14 + $0x4] sm:$0xf0]  ;;  %v913_v17 = vld [vmem:[%s1485_s14 + $0x60] sm:$0xf]  ;;  %v867_v21 = vld [vmem:[%s1485_s14 + $0x8] sm:$0xf0]  ;;  %p1296_p9 = scmp.lt.s32.totalorder %s1294_s13, %s1290_s29 }
  0x38   : > { %v1011_v18 = vld [vmem:[%s1485_s14 + $0x64] sm:$0xf0]  ;;  %v1022_v19 = vld [vmem:[#allocation5 + $0x40] sm:$0xff]  ;;  %v866_v22 = vor.u32 %v999_v16, %v865_v15  ;;  %v870_v24 = vor.u32 %v998_v20, %v867_v21  ;;  %v873_v25 = vld [vmem:[%s1485_s14 + $0x10] sm:$0xf]  ;;  %p1292_p4 = pnand %p1291_p1, %p1451_p5 }
  0x39   : > { %v914_v23 = vor.u32 %v1011_v18, %v913_v17  ;;  %v1001_v26 = vld [vmem:[%s1485_s14 + $0x14] sm:$0xf0]  ;;  %v921_v27 = vld [vmem:[%s1485_s14 + $0x70] sm:$0xf]  ;;  %v1000_v29 = vld [vmem:[%s1485_s14 + $0x14] sm:$0xf]  ;;  %p1297_p2 = por %p1296_p9, %p1295_p11 }
  0x3a   : > { %480 = vmatpush.bf16.msra.mxu0 %v1019_v4  ;;  %1080 = vmatpush.bf16.msra.mxu3 %v1019_v4  ;;  %v1013_v28 = vld [vmem:[%s1485_s14 + $0x74] sm:$0xf0]  ;;  %v875_v30 = vld [vmem:[%s1485_s14 + $0x18] sm:$0xf0]  ;;  %v874_v31 = vor.u32 %v1001_v26, %v873_v25  ;;  %v881_v34 = vld [vmem:[%s1485_s14 + $0x20] sm:$0xf]  ;;  %p1293_p8 = pneg %p1292_p4 }
  0x3b   : > { %529 = vmatpush.bf16.msra.mxu1 %v1027_v5  ;;  %v922_v32 = vor.u32 %v1013_v28, %v921_v27  ;;  %v878_v33 = vor.u32 %v1000_v29, %v875_v30  ;;  %v1003_v35 = vld [vmem:[%s1485_s14 + $0x24] sm:$0xf0]  ;;  %v1010_v36 = vld [vmem:[%s1485_s14 + $0x64] sm:$0xf]  ;;  %v915_v37 = vld [vmem:[%s1485_s14 + $0x68] sm:$0xf0] }
  0x3c   : > { %v1002_v38 = vld [vmem:[%s1485_s14 + $0x24] sm:$0xf]  ;;  %v883_v39 = vld [vmem:[%s1485_s14 + $0x28] sm:$0xf0]  ;;  %v882_v40 = vor.u32 %v1003_v35, %v881_v34  ;;  %v918_v41 = vor.u32 %v1010_v36, %v915_v37  ;;  %v889_v43 = vld [vmem:[%s1485_s14 + $0x30] sm:$0xf]  ;;  %p1298_p10 = pnand %p1297_p2, %p1293_p8 }
  0x3d   : > { %v886_v42 = vor.u32 %v1002_v38, %v883_v39  ;;  %v1005_v44 = vld [vmem:[%s1485_s14 + $0x34] sm:$0xf0]  ;;  %v1012_v45 = vld [vmem:[%s1485_s14 + $0x74] sm:$0xf]  ;;  %v923_v46 = vld [vmem:[%s1485_s14 + $0x78] sm:$0xf0] }
  0x3e   : > { %481 = vmatpush.bf16.msra.mxu0 %v1018_v6  ;;  %1081 = vmatpush.bf16.msra.mxu3 %v1018_v6  ;;  %v1004_v47 = vld [vmem:[%s1485_s14 + $0x34] sm:$0xf]  ;;  %v891_v48 = vld [vmem:[%s1485_s14 + $0x38] sm:$0xf0]  ;;  %v890_v49 = vor.u32 %v1005_v44, %v889_v43  ;;  %v926_v50 = vor.u32 %v1012_v45, %v923_v46  ;;  %v589_v54 = vld [vmem:[#allocation7 + $0x68] sm:$0xff] }
  0x3f   : > { %530 = vmatpush.bf16.msra.mxu1 %v1026_v7  ;;  %v894_v51 = vor.u32 %v1004_v47, %v891_v48  ;;  %v591_v52 = vld [vmem:[#allocation7 + $0x78] sm:$0xff]  ;;  %v590_v53 = vld [vmem:[#allocation7 + $0x70] sm:$0xff]  ;;  %v588_v55 = vld [vmem:[#allocation7 + $0x60] sm:$0xff] }
  0x40   : > { %596 = vmatpush.msra.mxu2 %v591_v52  ;;  %v587_v56 = vld [vmem:[#allocation7 + $0x58] sm:$0xff]  ;;  %v897_v57 = vld [vmem:[%s1485_s14 + $0x40] sm:$0xf]  ;;  %v1007_v58 = vld [vmem:[%s1485_s14 + $0x44] sm:$0xf0] }
  0x41   : > { %v586_v59 = vld [vmem:[#allocation7 + $0x50] sm:$0xff]  ;;  %v1006_v60 = vld [vmem:[%s1485_s14 + $0x44] sm:$0xf]  ;;  %v899_v61 = vld [vmem:[%s1485_s14 + $0x48] sm:$0xf0]  ;;  %v898_v63 = vor.u32 %v1007_v58, %v897_v57 }
  0x42   : > { %482 = vmatpush.bf16.msra.mxu0 %v1017_v8  ;;  %1082 = vmatpush.bf16.msra.mxu3 %v1017_v8  ;;  %v585_v62 = vld [vmem:[#allocation7 + $0x48] sm:$0xff]  ;;  %v902_v0 = vor.u32 %v1006_v60, %v899_v61  ;;  %v583_v2 = vld [vmem:[#allocation7 + $0x38] sm:$0xff]  ;;  %v576_v15 = vld [vmem:[#allocation7] sm:$0xff] }
  0x43   : > { %531 = vmatpush.bf16.msra.mxu1 %v1025_v9  ;;  %597 = vmatpush.msra.mxu2 %v590_v53  ;;  %v581_v4 = vld [vmem:[#allocation7 + $0x28] sm:$0xff]  ;;  %v579_v6 = vld [vmem:[#allocation7 + $0x18] sm:$0xff] }
  0x44   : > { %v1009_v8 = vld [vmem:[%s1485_s14 + $0x54] sm:$0xf0] }
  0x45   : > { %598 = vmatpush.msra.mxu2 %v589_v54 }
  0x46   : > { %483 = vmatpush.bf16.msra.mxu0 %v1016_v10  ;;  %1083 = vmatpush.bf16.msra.mxu3 %v1016_v10  ;;  %v1008_v10 = vld [vmem:[%s1485_s14 + $0x54] sm:$0xf] }
  0x47   : > { %532 = vmatpush.bf16.msra.mxu1 %v1024_v11  ;;  %599 = vmatpush.msra.mxu2 %v588_v55 }
  0x49   : > { %600 = vmatpush.msra.mxu2 %v587_v56 }
  0x4a   : > { %484 = vmatpush.bf16.msra.mxu0 %v1015_v12  ;;  %1084 = vmatpush.bf16.msra.mxu3 %v1015_v12 }
  0x4b   : > { %533 = vmatpush.bf16.msra.mxu1 %v1023_v13  ;;  %601 = vmatpush.msra.mxu2 %v586_v59 }
  0x4d   : > { %602 = vmatpush.msra.mxu2 %v585_v62 }
  0x4e   : > { %485 = vmatpush.bf16.msra.mxu0 %v1014_v14  ;;  %1085 = vmatpush.bf16.msra.mxu3 %v1014_v14  ;;  %v577_v14 = vld [vmem:[#allocation7 + $0x8] sm:$0xff] }
  0x4f   : > { %534 = vmatpush.bf16.msra.mxu1 %v1022_v19 }
  0x51   : > { %486 = vmatmul.bf16.vlgmr.msra.gmra.mxu0 %v866_v22  ;;  %516 = vmatmul.bf16.vlgmr.msra.gmra.mxu3 %v914_v23 }
  0x52   : > { %1086 = vmatpush.bf16.msrb.mxu3 %v1029_v1  ;;  %535 = vmatmul.bf16.vlgmr.msra.gmra.mxu1 %v870_v24  ;;  %v584_v1 = vld [vmem:[#allocation7 + $0x40] sm:$0xff] }
  0x53   : > { %603 = vmatpush.msra.mxu2 %v584_v1 }
  0x55   : > { %604 = vmatpush.msra.mxu2 %v583_v2 }
  0x56   : > { %1087 = vmatpush.bf16.msrb.mxu3 %v1028_v3  ;;  %v582_v3 = vld [vmem:[#allocation7 + $0x30] sm:$0xff] }
  0x57   : > { %605 = vmatpush.msra.mxu2 %v582_v3 }
  0x59   : > { %606 = vmatpush.msra.mxu2 %v581_v4 }
  0x5a   : > { %1088 = vmatpush.bf16.msrb.mxu3 %v1027_v5  ;;  %v580_v5 = vld [vmem:[#allocation7 + $0x20] sm:$0xff] }
  0x5b   : > { %607 = vmatpush.msra.mxu2 %v580_v5 }
  0x5d   : > { %608 = vmatpush.msra.mxu2 %v579_v6 }
  0x5e   : > { %1089 = vmatpush.bf16.msrb.mxu3 %v1026_v7  ;;  %v905_v7 = vld [vmem:[%s1485_s14 + $0x50] sm:$0xf] }
  0x5f   : > { %v906_v12 = vor.u32 %v1009_v8, %v905_v7 }
  0x61   : > { %491 = vmatmul.bf16.gmra.mxu0 %v874_v31  ;;  %521 = vmatmul.bf16.gmra.mxu3 %v922_v32 }
  0x62   : > { %1090 = vmatpush.bf16.msrb.mxu3 %v1025_v9  ;;  %540 = vmatmul.bf16.gmra.mxu1 %v878_v33  ;;  %v578_v9 = vld [vmem:[#allocation7 + $0x10] sm:$0xff] }
  0x63   : > { %609 = vmatpush.msra.mxu2 %v578_v9 }
  0x65   : > { %610 = vmatpush.msra.mxu2 %v577_v14 }
  0x66   : > { %1091 = vmatpush.bf16.msrb.mxu3 %v1024_v11  ;;  %v907_v11 = vld [vmem:[%s1485_s14 + $0x58] sm:$0xf0] }
  0x67   : > { %611 = vmatpush.msra.mxu2 %v576_v15 }
  0x6a   : > { %1092 = vmatpush.bf16.msrb.mxu3 %v1023_v13  ;;  %v910_v13 = vor.u32 %v1008_v10, %v907_v11 }
  0x6e   : > { %1093 = vmatpush.bf16.msrb.mxu3 %v1022_v19 }
  0x71   : > { %496 = vmatmul.bf16.gmra.mxu0 %v882_v40  ;;  %565 = vmatmul.bf16.vlgmr.msrb.gmra.mxu3 %v918_v41 }
  0x72   : > { %545 = vmatmul.bf16.gmra.mxu1 %v886_v42  ;;  %1094 = vmatpush.msra.mxu3 %v591_v52 }
  0x74   : > { %1095 = vmatpush.msra.mxu3 %v590_v53 }
  0x76   : > { %1096 = vmatpush.msra.mxu3 %v589_v54 }
  0x78   : > { %1097 = vmatpush.msra.mxu3 %v588_v55 }
  0x7a   : > { %1098 = vmatpush.msra.mxu3 %v587_v56 }
  0x7c   : > { %1099 = vmatpush.msra.mxu3 %v586_v59 }
  0x7e   : > { %1100 = vmatpush.msra.mxu3 %v585_v62 }
  0x80   : > { %1101 = vmatpush.msra.mxu3 %v584_v1  ;;  %v1530_v1 = vld [vmem:[%s1596_s3] ss:$0 sm:$0xff] }
  0x81   : > { %501 = vmatmul.bf16.gmra.mxu0 %v890_v49  ;;  %570 = vmatmul.bf16.gmra.mxu3 %v926_v50 }
  0x82   : > { %550 = vmatmul.bf16.gmra.mxu1 %v894_v51  ;;  %1102 = vmatpush.msra.mxu3 %v583_v2 }
  0x84   : > { %1103 = vmatpush.msra.mxu3 %v582_v3 }
  0x86   : > { %1104 = vmatpush.msra.mxu3 %v581_v4 }
  0x88   : > { %1105 = vmatpush.msra.mxu3 %v580_v5 }
  0x8a   : > { %1106 = vmatpush.msra.mxu3 %v579_v6 }
  0x8c   : > { %1107 = vmatpush.msra.mxu3 %v578_v9 }
  0x8e   : > { %1108 = vmatpush.msra.mxu3 %v577_v14 }
  0x90   : > { %1109 = vmatpush.msra.mxu3 %v576_v15 }
  0x91   : > { %506 = vmatmul.bf16.gmra.mxu0 %v898_v63 }
  0x92   : > { %555 = vmatmul.bf16.gmra.mxu1 %v902_v0 }
  0xa1   : > { %511 = vmatmul.bf16.gmra.mxu0 %v906_v12 }
  0xa2   : > { %560 = vmatmul.bf16.gmra.mxu1 %v910_v13 }
  0xce   : > { %v487_v16 = vpop.f32.mrf.mxu0 }
  0xcf   : > { %v536_v17 = vpop.f32.mrf.mxu1 }
  0xd0   : > { %v537_v18 = vadd.f32 %v536_v17, %v487_v16 }
  0xd2   : > { %612 = vmatmul.f32.vlgmr.msra.gmra.mxu2 %v537_v18 }
  0xd4   : > { %v517_v19 = vpop.f32.mrf.mxu3 }
  0xd6   : > { %v489_v20 = vpop.f32.mrf.mxu0 }
  0xd7   : > { %v538_v21 = vpop.f32.mrf.mxu1 }
  0xd8   : > { %v539_v22 = vadd.f32 %v538_v21, %v489_v20 }
  0xda   : > { %615 = vmatmul.f32.gmra.mxu2 %v539_v22 }
  0xdc   : > { %v519_v23 = vpop.f32.mrf.mxu3 }
  0xde   : > { %v492_v24 = vpop.f32.mrf.mxu0 }
  0xdf   : > { %v541_v25 = vpop.f32.mrf.mxu1 }
  0xe0   : > { %v542_v26 = vadd.f32 %v541_v25, %v492_v24 }
  0xe2   : > { %618 = vmatmul.f32.gmra.mxu2 %v542_v26 }
  0xe4   : > { %v522_v27 = vpop.f32.mrf.mxu3 }
  0xe6   : > { %v494_v28 = vpop.f32.mrf.mxu0 }
  0xe7   : > { %v543_v29 = vpop.f32.mrf.mxu1 }
  0xe8   : > { %v544_v30 = vadd.f32 %v543_v29, %v494_v28 }
  0xea   : > { %621 = vmatmul.f32.gmra.mxu2 %v544_v30 }
  0xec   : > { %v524_v31 = vpop.f32.mrf.mxu3 }
  0xee   : > { %v497_v32 = vpop.f32.mrf.mxu0 }
  0xef   : > { %v546_v33 = vpop.f32.mrf.mxu1 }
  0xf0   : > { %v547_v34 = vadd.f32 %v546_v33, %v497_v32 }
  0xf2   : > { %624 = vmatmul.f32.gmra.mxu2 %v547_v34 }
  0xf4   : > { %v566_v35 = vpop.f32.mrf.mxu3 }
  0xf5   : > { %v567_v36 = vadd.f32 %v566_v35, %v517_v19 }
  0xf6   : > { %v499_v37 = vpop.f32.mrf.mxu0 }
  0xf7   : > { %v548_v38 = vpop.f32.mrf.mxu1  ;;  %648 = vmatmul.f32.vlgmr.msra.gmra.mxu3 %v567_v36 }
  0xf8   : > { %v549_v39 = vadd.f32 %v548_v38, %v499_v37 }
  0xfa   : > { %627 = vmatmul.f32.gmra.mxu2 %v549_v39 }
  0xfc   : > { %v568_v40 = vpop.f32.mrf.mxu3 }
  0xfd   : > { %v569_v41 = vadd.f32 %v568_v40, %v519_v23 }
  0xfe   : > { %v502_v42 = vpop.f32.mrf.mxu0 }
  0xff   : > { %v551_v43 = vpop.f32.mrf.mxu1  ;;  %651 = vmatmul.f32.gmra.mxu3 %v569_v41 }
 0x100   : > { %v552_v44 = vadd.f32 %v551_v43, %v502_v42 }
 0x102   : > { %630 = vmatmul.f32.gmra.mxu2 %v552_v44 }
 0x104   : > { %v571_v45 = vpop.f32.mrf.mxu3 }
 0x105   : > { %v572_v46 = vadd.f32 %v571_v45, %v522_v27 }
 0x106   : > { %v504_v47 = vpop.f32.mrf.mxu0 }
 0x107   : > { %v553_v48 = vpop.f32.mrf.mxu1  ;;  %654 = vmatmul.f32.gmra.mxu3 %v572_v46 }
 0x108   : > { %v554_v49 = vadd.f32 %v553_v48, %v504_v47 }
 0x10a   : > { %633 = vmatmul.f32.gmra.mxu2 %v554_v49 }
 0x10c   : > { %v573_v50 = vpop.f32.mrf.mxu3 }
 0x10d   : > { %v574_v51 = vadd.f32 %v573_v50, %v524_v31 }
 0x10e   : > { %v507_v52 = vpop.f32.mrf.mxu0 }
 0x10f   : > { %v556_v53 = vpop.f32.mrf.mxu1  ;;  %657 = vmatmul.f32.gmra.mxu3 %v574_v51 }
 0x110   : > { %v557_v54 = vadd.f32 %v556_v53, %v507_v52 }
 0x112   : > { %636 = vmatmul.f32.gmra.mxu2 %v557_v54 }
 0x116   : > { %v509_v55 = vpop.f32.mrf.mxu0 }
 0x117   : > { %v558_v56 = vpop.f32.mrf.mxu1 }
 0x118   : > { %v559_v57 = vadd.f32 %v558_v56, %v509_v55 }
 0x11a   : > { %639 = vmatmul.f32.gmra.mxu2 %v559_v57 }
 0x11e   : > { %v512_v58 = vpop.f32.mrf.mxu0 }
 0x11f   : > { %v561_v59 = vpop.f32.mrf.mxu1 }
 0x120   : > { %v562_v60 = vadd.f32 %v561_v59, %v512_v58 }
 0x122   : > { %642 = vmatmul.f32.gmra.mxu2 %v562_v60 }
 0x126   : > { %v514_v61 = vpop.f32.mrf.mxu0 }
 0x127   : > { %v563_v62 = vpop.f32.mrf.mxu1 }
 0x128   : > { %v564_v63 = vadd.f32 %v563_v62, %v514_v61 }
 0x12a   : > { %645 = vmatmul.f32.gmra.mxu2 %v564_v63 }
 0x155   : > { %v613_v0 = vpop.f32.mrf.mxu2 }
 0x156   : > { %v614_v2 = vadd.f32 %v1530_v1, %v613_v0 }
 0x158   : > { %v677_v4 = vmul.f32 0.01, %v614_v2  ;;  %vm661_vm0 = vcmp.ge.f32.partialorder %v614_v2, 0.0 }
 0x15a   : > { %v693_v7 = vsel %vm661_vm0, %v614_v2, %v677_v4 }
 0x15d   : > { %v616_v3 = vpop.f32.mrf.mxu2 }
 0x15e   : > { %v617_v5 = vadd.f32 %v1530_v1, %v616_v3 }
 0x160   : > { %vm662_vm1 = vcmp.ge.f32.partialorder %v617_v5, 0.0  ;;  %v678_v6 = vmul.f32 0.01, %v617_v5 }
 0x162   : > { %v694_v8 = vsel %vm662_vm1, %v617_v5, %v678_v6 }
 0x163   : > { %v1034_v9 = vpack.c.bf16 %v694_v8, %v693_v7 }
 0x165   : > { %1035 = vst [vmem:[%s1535_s11] sm:$0xff] %v1034_v9   ;;  %v619_v10 = vpop.f32.mrf.mxu2 }
 0x166   : > { %v620_v11 = vadd.f32 %v1530_v1, %v619_v10 }
 0x168   : > { %v679_v13 = vmul.f32 0.01, %v620_v11  ;;  %vm663_vm2 = vcmp.ge.f32.partialorder %v620_v11, 0.0 }
 0x16a   : > { %v695_v16 = vsel %vm663_vm2, %v620_v11, %v679_v13 }
 0x16d   : > { %v622_v12 = vpop.f32.mrf.mxu2 }
 0x16e   : > { %v623_v14 = vadd.f32 %v1530_v1, %v622_v12 }
 0x170   : > { %vm664_vm3 = vcmp.ge.f32.partialorder %v623_v14, 0.0  ;;  %v680_v15 = vmul.f32 0.01, %v623_v14 }
 0x172   : > { %v696_v17 = vsel %vm664_vm3, %v623_v14, %v680_v15 }
 0x173   : > { %v1039_v18 = vpack.c.bf16 %v696_v17, %v695_v16 }
 0x175   : > { %1071 = vst [vmem:[%s1535_s11 + $0x8] sm:$0xff] %v1039_v18   ;;  %v625_v19 = vpop.f32.mrf.mxu2 }
 0x176   : > { %v626_v20 = vadd.f32 %v1530_v1, %v625_v19 }
 0x178   : > { %v681_v23 = vmul.f32 0.01, %v626_v20  ;;  %vm665_vm4 = vcmp.ge.f32.partialorder %v626_v20, 0.0 }
 0x17a   : > { %v649_v21 = vpop.f32.mrf.mxu3  ;;  %v697_v27 = vsel %vm665_vm4, %v626_v20, %v681_v23 }
 0x17b   : > { %v650_v25 = vadd.f32 %v1530_v1, %v649_v21 }
 0x17d   : > { %v628_v22 = vpop.f32.mrf.mxu2  ;;  %v689_v30 = vmul.f32 0.01, %v650_v25  ;;  %vm673_vm6 = vcmp.ge.f32.partialorder %v650_v25, 0.0 }
 0x17e   : > { %v629_v24 = vadd.f32 %v1530_v1, %v628_v22 }
 0x17f   : > { %v705_v35 = vsel %vm673_vm6, %v650_v25, %v689_v30 }
 0x180   : > { %vm666_vm5 = vcmp.ge.f32.partialorder %v629_v24, 0.0  ;;  %v682_v26 = vmul.f32 0.01, %v629_v24 }
 0x182   : > { %v698_v28 = vsel %vm666_vm5, %v629_v24, %v682_v26  ;;  %v652_v29 = vpop.f32.mrf.mxu3 }
 0x183   : > { %v1044_v31 = vpack.c.bf16 %v698_v28, %v697_v27  ;;  %v653_v32 = vadd.f32 %v1530_v1, %v652_v29 }
 0x185   : > { %1072 = vst [vmem:[%s1535_s11 + $0x10] sm:$0xff] %v1044_v31   ;;  %vm674_vm7 = vcmp.ge.f32.partialorder %v653_v32, 0.0  ;;  %v690_v33 = vmul.f32 0.01, %v653_v32  ;;  %v631_v34 = vpop.f32.mrf.mxu2 }
 0x186   : > { %v632_v38 = vadd.f32 %v1530_v1, %v631_v34 }
 0x187   : > { %v706_v36 = vsel %vm674_vm7, %v653_v32, %v690_v33 }
 0x188   : > { %v1064_v37 = vpack.c.bf16 %v706_v36, %v705_v35  ;;  %v683_v41 = vmul.f32 0.01, %v632_v38  ;;  %vm667_vm8 = vcmp.ge.f32.partialorder %v632_v38, 0.0 }
 0x18a   : > { %1076 = vst [vmem:[%s1535_s11 + $0x30] sm:$0xff] %v1064_v37   ;;  %v655_v39 = vpop.f32.mrf.mxu3  ;;  %v699_v45 = vsel %vm667_vm8, %v632_v38, %v683_v41 }
 0x18b   : > { %v656_v43 = vadd.f32 %v1530_v1, %v655_v39 }
 0x18d   : > { %v634_v40 = vpop.f32.mrf.mxu2  ;;  %v691_v48 = vmul.f32 0.01, %v656_v43  ;;  %vm675_vm10 = vcmp.ge.f32.partialorder %v656_v43, 0.0 }
 0x18e   : > { %v635_v42 = vadd.f32 %v1530_v1, %v634_v40 }
 0x18f   : > { %v707_v53 = vsel %vm675_vm10, %v656_v43, %v691_v48 }
 0x190   : > { %vm668_vm9 = vcmp.ge.f32.partialorder %v635_v42, 0.0  ;;  %v684_v44 = vmul.f32 0.01, %v635_v42 }
 0x192   : > { %v700_v46 = vsel %vm668_vm9, %v635_v42, %v684_v44  ;;  %v658_v47 = vpop.f32.mrf.mxu3 }
 0x193   : > { %v1049_v49 = vpack.c.bf16 %v700_v46, %v699_v45  ;;  %v659_v50 = vadd.f32 %v1530_v1, %v658_v47 }
 0x195   : > { %1073 = vst [vmem:[%s1535_s11 + $0x18] sm:$0xff] %v1049_v49   ;;  %vm676_vm11 = vcmp.ge.f32.partialorder %v659_v50, 0.0  ;;  %v692_v51 = vmul.f32 0.01, %v659_v50  ;;  %v637_v52 = vpop.f32.mrf.mxu2 }
 0x196   : > { %v638_v56 = vadd.f32 %v1530_v1, %v637_v52 }
 0x197   : > { %v708_v54 = vsel %vm676_vm11, %v659_v50, %v692_v51 }
 0x198   : > { %v1069_v55 = vpack.c.bf16 %v708_v54, %v707_v53  ;;  %v685_v58 = vmul.f32 0.01, %v638_v56  ;;  %vm669_vm12 = vcmp.ge.f32.partialorder %v638_v56, 0.0 }
 0x19a   : > { %1077 = vst [vmem:[%s1535_s11 + $0x38] sm:$0xff] %v1069_v55   ;;  %v701_v61 = vsel %vm669_vm12, %v638_v56, %v685_v58 }
 0x19d   : > { %v640_v57 = vpop.f32.mrf.mxu2 }
 0x19e   : > { %v641_v59 = vadd.f32 %v1530_v1, %v640_v57 }
 0x1a0   : > { %vm670_vm13 = vcmp.ge.f32.partialorder %v641_v59, 0.0  ;;  %v686_v60 = vmul.f32 0.01, %v641_v59 }
 0x1a2   : > { %v702_v62 = vsel %vm670_vm13, %v641_v59, %v686_v60 }
 0x1a3   : > { %v1054_v63 = vpack.c.bf16 %v702_v62, %v701_v61 }
 0x1a5   : > { %1074 = vst [vmem:[%s1535_s11 + $0x20] sm:$0xff] %v1054_v63   ;;  %v643_v0 = vpop.f32.mrf.mxu2 }
 0x1a6   : > { %v644_v2 = vadd.f32 %v1530_v1, %v643_v0 }
 0x1a8   : > { %v687_v4 = vmul.f32 0.01, %v644_v2  ;;  %vm671_vm14 = vcmp.ge.f32.partialorder %v644_v2, 0.0 }
 0x1aa   : > { %v703_v7 = vsel %vm671_vm14, %v644_v2, %v687_v4 }
 0x1ad   : > { %v646_v3 = vpop.f32.mrf.mxu2 }
 0x1ae   : > { %v647_v5 = vadd.f32 %v1530_v1, %v646_v3 }
 0x1b0   : > { %vm672_vm15 = vcmp.ge.f32.partialorder %v647_v5, 0.0  ;;  %v688_v6 = vmul.f32 0.01, %v647_v5 }
 0x1b2   : > { %v704_v8 = vsel %vm672_vm15, %v647_v5, %v688_v6 }
 0x1b3   : > { %v1059_v9 = vpack.c.bf16 %v704_v8, %v703_v7 }
 0x1b5   : > { %1075 = vst [vmem:[%s1535_s11 + $0x28] sm:$0xff] %v1059_v9  }
 0x1b6   : > { %1301 = shalt.err (!%p1298_p10)
}
 0x1b7   : > { %s1352_s24 = smov 64   ;;  %s1353_s26 = smov 4  }
 0x1b8   : > { %1120 = dma.vmem_to_hbm [thread:$0]  (%p1451_p5), %s755_s27, 1024, %s757_s25, %s742_s19, %s1352_s24, %s1352_s24, %s1353_s26  }
 0x1b9 PF: > { %s771_s10 = sand.u32 1, %s1332_s15   ;;  %p1603_p12 = scmp.ge.s32.totalorder %s1344_s18, 2 }
 0x1ba   : > { %s772_s11 = scalar_lea.sflag [#allocation4], %s771_s10 }
 0x1bb   : > { %p1134_p13 = pnand %p1603_p12, %p1414_p6 }
 0x1bd   : > { %p1135_p0 = pneg %p1134_p13 }
 0x1bf   : > { %1327 = dma.done.wait (%p1135_p0), %s772_s11, 1024  }
 0x1c0   : > { %1329 = vsyncadd (%p1135_p0), %s772_s11, 4294966272  ;;  %p18_p3 = scmp.ge.s32.totalorder %s1438_s12, 4   ;;  %s1604_s15 = smov %s1336_s16 }
 0x1c1   : > { %s1605_s16 = smov %s1340_s17  ;;  %s1606_s17 = smov %s1447_s20 }
 0x1c2   : > { %s1607_s18 = smov %s1438_s12  ;;  %20 = sbr.rel (!%p18_p3) target bundleno = 6 (0x6), region = 89 }
 0x1c7   :  { %778 = vsyncpa [#allocation3], 1 }
 0x1c8   :  { %780 = vsyncpa [#allocation3 + $0x1], 1 }
 0x1c9   :  { %781 = vsyncpa [#allocation6], 1 }
 0x1ca   :  { %782 = vsyncpa [#allocation4], 1 }
 0x1cb   :  { %784 = vsyncpa [#allocation4 + $0x1], 1 }

</bundles_post_ra>
